<compile_context>
chip_gen: v7x
topology: tpu7x:2x2x1
jax: 0.10.0
libtpu: 0.0.40
codegen_flags: <defaults>
</compile_context>

<pallas_src>
import functools

import jax
import jax.numpy as jnp
from jax.experimental import pallas as pl
from jax.experimental.pallas import tpu as pltpu

E_LAMBDA = 1e-4


def _vmem_capacity_bytes():
    try:
        info = pltpu.get_tpu_info()
        cap = getattr(info, "vmem_capacity_bytes", None)
        if cap:
            return int(cap)
    except Exception:
        pass
    return 64 * 1024 * 1024  # conservative default (v7x-sized VMEM)


def _budgets():
    """(target_block_bytes, vmem_limit_bytes) per TPU generation."""
    cap = _vmem_capacity_bytes()
    if cap >= 128 * 1024 * 1024:                       # v5e / v6e
        return 8 * 1024 * 1024, 64 * 1024 * 1024
    return 4 * 1024 * 1024, 32 * 1024 * 1024           # v7x (64 MiB VMEM)


def _pick_group(bc, L):
    """Largest g <= 128 // L dividing B*C, so (B, C, L) -> (B*C/g, g*L) is a
    free contiguous reshape and rows are ~lane-dense."""
    g_max = max(1, 128 // L)
    for g in range(min(g_max, bc), 0, -1):
        if bc % g == 0:
            return g
    return 1


def _pick_rows(R, row_bytes, target_bytes, sub_mult):
    """Row-tile size: as big as the per-block byte budget allows, but always
    at least two grid steps (when possible) so both v7x cores get work."""
    budget_rows = max(1, target_bytes // row_bytes)
    if budget_rows >= R:
        if R >= 2 * sub_mult:
            half = -(-R // 2)
            tr = -(-half // sub_mult) * sub_mult
            if tr < R:
                return tr
        return R
    return max(sub_mult, (budget_rows // sub_mult) * sub_mult)


def _qtsimam_grouped_kernel(x_ref, bias_ref, seg_ref, segt_ref, o_ref, *, inv_n):
    # x_ref:    (tR, g*L) native dtype, lane-dense (each row = g channels)
    # bias_ref: (tR, g)   f32, per-channel d + 0.5*lq + e_lambda
    # seg_ref:  (g*L, g)  0/1 segment matrix, seg[k, j] = (k // L == j)
    # segt_ref: (g, g*L)  its transpose
    x = x_ref[...]
    seg = seg_ref[...]
    # Segmented per-channel sums on the otherwise-idle MXU, f32 accumulate.
    sums = jnp.dot(x, seg, preferred_element_type=jnp.float32)         # (tR, g)
    sumsq = jnp.dot(x * x, seg, preferred_element_type=jnp.float32)    # (tR, g)
    mu = sums * inv_n
    var = jnp.maximum(sumsq * inv_n - mu * mu, 0.0)     # single-pass, clamped
    gate = jax.nn.sigmoid(var + bias_ref[...])          # (tR, g) f32 -> EUP
    # Broadcast the gate back to the lane-dense layout with the same matrix.
    gate_w = jnp.dot(gate.astype(x.dtype), segt_ref[...],
                     preferred_element_type=jnp.float32).astype(x.dtype)
    o_ref[...] = (x * gate_w).astype(o_ref.dtype)


def _qtsimam_plain_kernel(x_ref, bias_ref, o_ref, *, inv_n):
    # L >= 128: one channel per row, lanes already dense -> plain VPU reduce.
    xf = x_ref[...].astype(jnp.float32)
    sums = jnp.sum(xf, axis=-1, keepdims=True)
    sumsq = jnp.sum(xf * xf, axis=-1, keepdims=True)
    mu = sums * inv_n
    var = jnp.maximum(sumsq * inv_n - mu * mu, 0.0)
    gate = jax.nn.sigmoid(var + bias_ref[...])          # (tR, 1) f32
    o_ref[...] = (x_ref[...] * gate.astype(o_ref.dtype)).astype(o_ref.dtype)


def qtsimam(x, d, lq, *, e_lambda=E_LAMBDA):
    """x: (B, C, L); d, lq broadcastable to (B, C, 1).  Returns (B, C, L)."""
    B, C, L = x.shape
    dtype = x.dtype
    itemsize = jnp.dtype(dtype).itemsize

    # Fold the additive terms into one per-channel bias, kept in f32 so
    # e_lambda / d / lq are not rounded before the in-kernel (f32) add.
    bias = jnp.broadcast_to(
        d.astype(jnp.float32) + 0.5 * lq.astype(jnp.float32) + e_lambda,
        (B, C, 1),
    )

    g = _pick_group(B * C, L)
    R = (B * C) // g
    gL = g * L

    # Free, contiguous reshapes (pure dim merges -> no HBM data movement).
    x2 = x.reshape(R, gL)
    bias2 = bias.reshape(R, g)

    target_block_bytes, vmem_limit = _budgets()
    sub_mult = 8 * max(1, 4 // itemsize)          # 8 f32, 16 bf16, 32 int8/fp8
    tR = _pick_rows(R, gL * itemsize, target_block_bytes, sub_mult)
    grid = (pl.cdiv(R, tR),)

    x_spec = pl.BlockSpec((tR, gL), lambda r: (r, 0))
    bias_spec = pl.BlockSpec((tR, g), lambda r: (r, 0))
    out_spec = pl.BlockSpec((tR, gL), lambda r: (r, 0))

    if g > 1:
        # 0/1 segment matrix: column j selects the lanes of channel j in a row.
        lane_group = jnp.arange(gL, dtype=jnp.int32)[:, None] // L   # (gL, 1)
        col = jnp.arange(g, dtype=jnp.int32)[None, :]                # (1, g)
        seg = (lane_group == col).astype(dtype)                      # (gL, g)
        segt = jnp.transpose(seg)                                    # (g, gL)
        in_specs = [
            x_spec,
            bias_spec,
            pl.BlockSpec((gL, g), lambda r: (0, 0)),   # constant -> DMA'd once
            pl.BlockSpec((g, gL), lambda r: (0, 0)),   # constant -> DMA'd once
        ]
        operands = (x2, bias2, seg, segt)
        kernel = functools.partial(_qtsimam_grouped_kernel, inv_n=1.0 / L)
    else:
        in_specs = [x_spec, bias_spec]
        operands = (x2, bias2)
        kernel = functools.partial(_qtsimam_plain_kernel, inv_n=1.0 / L)

    out2 = pl.pallas_call(
        kernel,
        out_shape=jax.ShapeDtypeStruct((R, gL), dtype),
        grid=grid,
        in_specs=in_specs,
        out_specs=out_spec,
        compiler_params=pltpu.CompilerParams(
            dimension_semantics=("parallel",),
            vmem_limit_bytes=vmem_limit,
        ),
    )(*operands)

    return out2.reshape(B, C, L)


def qtsimam_ref(x, d, lq, e_lambda=E_LAMBDA):
    mu = jnp.mean(x, axis=2, keepdims=True)
    e = jnp.mean((x - mu) ** 2, axis=2, keepdims=True) + d + 0.5 * lq + e_lambda
    return x * jax.nn.sigmoid(e)


if __name__ == "__main__":
    key = jax.random.PRNGKey(0)
    kx, kd, kl = jax.random.split(key, 3)

    def check(B, C, L, tag):
        x = jax.random.normal(kx, (B, C, L), dtype=jnp.float32)
        d = jax.random.uniform(kd, (B, C, 1), dtype=jnp.float32)    # queue delay
        lq = jax.random.uniform(kl, (B, C, 1), dtype=jnp.float32)   # queue length
        out = jax.block_until_ready(qtsimam(x, d, lq))
        ref = qtsimam_ref(x, d, lq)
        assert out.shape == ref.shape, f"shape mismatch ({tag})"
        assert jnp.allclose(out, ref, atol=2e-5, rtol=2e-5), f"mismatch ({tag})"

    # Small case in the module's native (B, channels, seq) layout (g=8 packing).
    check(2, 4, 16, "small")
    # Real post-conv flavor (C=128, short seq) -> lane-packed grouped path.
    check(2, 128, 8, "lane-packed")
    # Long-sequence flavor (L >= 128) -> plain per-row reduce path.
    check(2, 8, 256, "long-seq")

    print("KERNEL_OK")
</pallas_src>

<mosaic_0001>
module attributes {stable_mosaic.version = 11 : i64} {
  func.func @_qtsimam_grouped_kernel(%arg0: i32, %arg1: memref<1x128xf32, #tpu.memory_space<vmem>>, %arg2: memref<1x8xf32, #tpu.memory_space<vmem>>, %arg3: memref<128x8xf32, #tpu.memory_space<vmem>>, %arg4: memref<8x128xf32, #tpu.memory_space<vmem>>, %arg5: memref<1x128xf32, #tpu.memory_space<vmem>>) attributes {dimension_semantics = [#tpu.dimension_semantics<parallel>], iteration_bounds = array<i64: 1>, scalar_prefetch = 0 : i64, scratch_operands = 0 : i64, tpu.core_type = #tpu.core_type<tc>, window_params = [{transform_indices = @transform_0, window_bounds = array<i64: 1, 128>}, {transform_indices = @transform_1, window_bounds = array<i64: 1, 8>}, {pipeline_mode = #tpu.pipeline_mode<synchronous>, transform_indices = @transform_2, window_bounds = array<i64: 128, 8>}, {pipeline_mode = #tpu.pipeline_mode<synchronous>, transform_indices = @transform_3, window_bounds = array<i64: 8, 128>}, {transform_indices = @transform_4, window_bounds = array<i64: 1, 128>}]} {
    %c0 = arith.constant 0 : index
    %c0_0 = arith.constant 0 : index
    %0 = vector.load %arg1[%c0, %c0_0] : memref<1x128xf32, #tpu.memory_space<vmem>>, vector<1x128xf32>
    %c0_1 = arith.constant 0 : index
    %c0_2 = arith.constant 0 : index
    %1 = vector.load %arg3[%c0_1, %c0_2] : memref<128x8xf32, #tpu.memory_space<vmem>>, vector<128x8xf32>
    %cst = arith.constant dense<0.000000e+00> : vector<1x8xf32>
    %2 = tpu.matmul %0, %1, %cst {dimension_numbers = #tpu.dot_dimension_numbers<[1], [0], [0], [1], [0, 0, 1, 1], [], []>} : vector<1x128xf32>, vector<128x8xf32>, vector<1x8xf32> -> vector<1x8xf32>
    %3 = arith.mulf %0, %0 : vector<1x128xf32>
    %cst_3 = arith.constant dense<0.000000e+00> : vector<1x8xf32>
    %4 = tpu.matmul %3, %1, %cst_3 {dimension_numbers = #tpu.dot_dimension_numbers<[1], [0], [0], [1], [0, 0, 1, 1], [], []>} : vector<1x128xf32>, vector<128x8xf32>, vector<1x8xf32> -> vector<1x8xf32>
    %cst_4 = arith.constant 6.250000e-02 : f32
    %5 = vector.broadcast %cst_4 : f32 to vector<1x8xf32>
    %6 = arith.mulf %2, %5 : vector<1x8xf32>
    %cst_5 = arith.constant 6.250000e-02 : f32
    %7 = vector.broadcast %cst_5 : f32 to vector<1x8xf32>
    %8 = arith.mulf %4, %7 : vector<1x8xf32>
    %9 = arith.mulf %6, %6 : vector<1x8xf32>
    %10 = arith.subf %8, %9 : vector<1x8xf32>
    %cst_6 = arith.constant 0.000000e+00 : f32
    %11 = vector.broadcast %cst_6 : f32 to vector<1x8xf32>
    %12 = arith.maximumf %10, %11 : vector<1x8xf32>
    %c0_7 = arith.constant 0 : index
    %c0_8 = arith.constant 0 : index
    %13 = vector.load %arg2[%c0_7, %c0_8] : memref<1x8xf32, #tpu.memory_space<vmem>>, vector<1x8xf32>
    %14 = arith.addf %12, %13 : vector<1x8xf32>
    %15 = arith.negf %14 : vector<1x8xf32>
    %16 = math.exp %15 : vector<1x8xf32>
    %cst_9 = arith.constant 1.000000e+00 : f32
    %17 = vector.broadcast %cst_9 : f32 to vector<1x8xf32>
    %18 = arith.addf %17, %16 : vector<1x8xf32>
    %19 = arith.divf %17, %18 : vector<1x8xf32>
    %c0_10 = arith.constant 0 : index
    %c0_11 = arith.constant 0 : index
    %20 = vector.load %arg4[%c0_10, %c0_11] : memref<8x128xf32, #tpu.memory_space<vmem>>, vector<8x128xf32>
    %cst_12 = arith.constant dense<0.000000e+00> : vector<1x128xf32>
    %21 = tpu.matmul %19, %20, %cst_12 {dimension_numbers = #tpu.dot_dimension_numbers<[1], [0], [0], [1], [0, 0, 1, 1], [], []>} : vector<1x8xf32>, vector<8x128xf32>, vector<1x128xf32> -> vector<1x128xf32>
    %22 = arith.mulf %0, %21 : vector<1x128xf32>
    %c0_13 = arith.constant 0 : index
    %c0_14 = arith.constant 0 : index
    %23 = vector.load %arg5[%c0_13, %c0_14] : memref<1x128xf32, #tpu.memory_space<vmem>>, vector<1x128xf32>
    tpu.vector_store %arg5[%c0_13, %c0_14], %22 {strides = array<i32>} : memref<1x128xf32, #tpu.memory_space<vmem>>, vector<1x128xf32>,
    return
  }
  func.func @transform_0(%arg0: i32) -> (i32, i32) {
    %c0_i32 = arith.constant 0 : i32
    %c0_i32_0 = arith.constant 0 : i32
    return %arg0, %c0_i32 : i32, i32
  }
  func.func @transform_1(%arg0: i32) -> (i32, i32) {
    %c0_i32 = arith.constant 0 : i32
    %c0_i32_0 = arith.constant 0 : i32
    return %arg0, %c0_i32 : i32, i32
  }
  func.func @transform_2(%arg0: i32) -> (i32, i32) {
    %c0_i32 = arith.constant 0 : i32
    %c0_i32_0 = arith.constant 0 : i32
    %c0_i32_1 = arith.constant 0 : i32
    return %c0_i32, %c0_i32_0 : i32, i32
  }
  func.func @transform_3(%arg0: i32) -> (i32, i32) {
    %c0_i32 = arith.constant 0 : i32
    %c0_i32_0 = arith.constant 0 : i32
    %c0_i32_1 = arith.constant 0 : i32
    return %c0_i32, %c0_i32_0 : i32, i32
  }
  func.func @transform_4(%arg0: i32) -> (i32, i32) {
    %c0_i32 = arith.constant 0 : i32
    %c0_i32_0 = arith.constant 0 : i32
    return %arg0, %c0_i32 : i32, i32
  }
}

</mosaic_0001>

<bundles_post_ra>
// kernel: tpu_custom_call.1
= control target key start
LH: loop header
LB: loop body
LE: loop exit
PB: predicated region body
PF: predicated region fallthrough
CT: control target
= control target key end

     0   :  { %v473_v3 = vmov 0.0|0.0   ;;  %vm474_vm0 = vmmov 0   ;;  %v475_v6 = vmov 0.0   ;;  %s574_s0 = inlined_call_operand.vmem [shape: f32[1,128], index: 0, kind: input, shape index: {}]   ;;  %s575_s1 = inlined_call_operand.vmem [shape: f32[1,8], index: 1, kind: input, shape index: {}]   ;;  %s576_s2 = inlined_call_operand.vmem [shape: f32[128,8], index: 2, kind: input, shape index: {}]   ;;  %s577_s3 = inlined_call_operand.vmem [shape: f32[8,128], index: 3, kind: input, shape index: {}]   ;;  %s578_s4 = inlined_call_operand.hbm [shape: f32[1,128], index: 4, kind: output, shape index: {}]  }
   0x1   :  { %v19_v0 = vld [vmem:[%s576_s2] sm:$0xff]  ;;  %v20_v1 = vld [vmem:[%s576_s2 + $0x8] sm:$0xff]  ;;  %v21_v2 = vld [vmem:[%s576_s2 + $0x10] sm:$0xff]  ;;  %393 = vmatprep.subr.bf16.mxu0 %v473_v3  ;;  %417 = vmatprep.subr.bf16.mxu1 %v473_v3 }
   0x2   :  { %v394_v4 = vpack.c.bf16 %v20_v1, %v19_v0  ;;  %v22_v5 = vld [vmem:[%s576_s2 + $0x18] sm:$0xff]  ;;  %350 = vmatprep.mubr.msk.f32.mxu0 %vm474_vm0, %v475_v6  ;;  %385 = vmatprep.mubr.msk.f32.mxu1 %vm474_vm0, %v475_v6  ;;  %v23_v8 = vld [vmem:[%s576_s2 + $0x20] sm:$0xff]  ;;  %v24_v9 = vld [vmem:[%s576_s2 + $0x28] sm:$0xff] }
   0x3   :  { %v397_v7 = vpack.c.bf16 %v22_v5, %v21_v2 }
   0x4   :  { %395 = vmatpush3.bf16.msra.mxu0 %v394_v4  ;;  %419 = vmatpush3.bf16.msra.mxu1 %v394_v4 }
   0x5   :  { %396 = vmatprep.subr.bf16.mxu0 %v473_v3  ;;  %420 = vmatprep.subr.bf16.mxu1 %v473_v3 }
   0x6   :  { %9 = vsyncpa [#allocation3], 0  ;;  %v400_v10 = vpack.c.bf16 %v24_v9, %v23_v8  ;;  %v25_v11 = vld [vmem:[%s576_s2 + $0x30] sm:$0xff]  ;;  %v26_v12 = vld [vmem:[%s576_s2 + $0x38] sm:$0xff]  ;;  %vm190_vm1 = vcmask 64512  }
   0x7   :  { %v403_v13 = vpack.c.bf16 %v26_v12, %v25_v11  ;;  %v27_v14 = vld [vmem:[%s576_s2 + $0x40] sm:$0xff]  ;;  %v28_v15 = vld [vmem:[%s576_s2 + $0x48] sm:$0xff]  ;;  %v29_v17 = vld [vmem:[%s576_s2 + $0x50] sm:$0xff] }
   0x8   :  { %398 = vmatpush3.bf16.msra.mxu0 %v397_v7  ;;  %422 = vmatpush3.bf16.msra.mxu1 %v397_v7  ;;  %v406_v16 = vpack.c.bf16 %v28_v15, %v27_v14  ;;  %v30_v18 = vld [vmem:[%s576_s2 + $0x58] sm:$0xff]  ;;  %v31_v20 = vld [vmem:[%s576_s2 + $0x60] sm:$0xff]  ;;  %v32_v21 = vld [vmem:[%s576_s2 + $0x68] sm:$0xff] }
   0x9   :  { %399 = vmatprep.subr.bf16.mxu0 %v473_v3  ;;  %423 = vmatprep.subr.bf16.mxu1 %v473_v3  ;;  %v409_v19 = vpack.c.bf16 %v30_v18, %v29_v17  ;;  %v412_v22 = vpack.c.bf16 %v32_v21, %v31_v20  ;;  %v33_v23 = vld [vmem:[%s576_s2 + $0x70] sm:$0xff]  ;;  %v34_v24 = vld [vmem:[%s576_s2 + $0x78] sm:$0xff]  ;;  %v18_v26 = vld [vmem:[%s574_s0] sm:$0x1] }
   0xa   :  { %v415_v25 = vpack.c.bf16 %v34_v24, %v33_v23  ;;  %v105_v27 = vmul.f32 %v18_v26, %v18_v26  ;;  %v189_v28 = vld [vmem:[%s577_s3] sm:$0xff]  ;;  %s476_s3 = smov [#allocation2]  }
   0xb   :  { %v181_v37 = vld [vmem:[%s575_s1] sm:$0x1]  ;;  %s272_s25 = sshll.u32 %s476_s3, 4  ;;  %s273_s25 = int_to_ptr.vmem [resolvable:$true] %s272_s25 }
   0xc   :  { %401 = vmatpush3.bf16.msra.mxu0 %v400_v10  ;;  %425 = vmatpush3.bf16.msra.mxu1 %v400_v10  ;;  %s449_s26 = scalar_lea.vmem %s273_s25, 16  ;;  %s453_s1 = scalar_lea.vmem %s273_s25, 32 }
   0xd   :  { %402 = vmatprep.subr.bf16.mxu0 %v473_v3  ;;  %426 = vmatprep.subr.bf16.mxu1 %v473_v3  ;;  %p450_p0 = scmp.ne.s32.totalorder %s273_s25, %s449_s26  ;;  %p454_p1 = scmp.lt.s32.totalorder %s273_s25, %s273_s25 }
   0xe   :  { %p455_p2 = scmp.lt.s32.totalorder %s453_s1, %s449_s26 }
  0x10   :  { %404 = vmatpush3.bf16.msra.mxu0 %v403_v13  ;;  %428 = vmatpush3.bf16.msra.mxu1 %v403_v13  ;;  %p456_p3 = por %p455_p2, %p454_p1 }
  0x11   :  { %405 = vmatprep.subr.bf16.mxu0 %v473_v3  ;;  %429 = vmatprep.subr.bf16.mxu1 %v473_v3 }
  0x12   :  { %p457_p4 = pnand %p456_p3, %p450_p0 }
  0x14   :  { %407 = vmatpush3.bf16.msra.mxu0 %v406_v16  ;;  %431 = vmatpush3.bf16.msra.mxu1 %v406_v16 }
  0x15   :  { %408 = vmatprep.subr.bf16.mxu0 %v473_v3  ;;  %432 = vmatprep.subr.bf16.mxu1 %v473_v3 }
  0x18   :  { %410 = vmatpush3.bf16.msra.mxu0 %v409_v19  ;;  %434 = vmatpush3.bf16.msra.mxu1 %v409_v19 }
  0x19   :  { %411 = vmatprep.subr.bf16.mxu0 %v473_v3  ;;  %435 = vmatprep.subr.bf16.mxu1 %v473_v3 }
  0x1c   :  { %413 = vmatpush3.bf16.msra.mxu0 %v412_v22  ;;  %437 = vmatpush3.bf16.msra.mxu1 %v412_v22 }
  0x1d   :  { %414 = vmatprep.subr.bf16.mxu0 %v473_v3  ;;  %438 = vmatprep.subr.bf16.mxu1 %v473_v3 }
  0x20   :  { %416 = vmatpush3.bf16.msra.mxu0 %v415_v25  ;;  %440 = vmatpush3.bf16.msra.mxu1 %v415_v25 }
  0x21   :  { %388 = vmatprep.subr.mxu0 %v475_v6 }
  0x23   :  { %351 = vmatmul.mubr.f32.vlgmr.msra.gmra.mrb[0].mxu0 %v18_v26  ;;  %386 = vmatmul.mubr.f32.vlgmr.msra.gmra.mrb[0].mxu1 %v105_v27 }
  0x24   :  { %390 = vmatprep.mubr.msk.f32.mxu0 %vm474_vm0, %v475_v6  ;;  %389 = vmatpush3.msra.mxu0 %v189_v28 }
  0xf6   :  { %v101_v29 = vpop.f32.mrb[0].mxu0  ;;  %v172_v30 = vpop.f32.mrb[0].mxu1 }
  0xf7   :  { %v176_v31 = vmul.f32 0.0625, %v101_v29  ;;  %v352_v32 = vpop.f32.mrb[1].mxu0  ;;  %v177_v33 = vmul.f32 0.0625, %v172_v30  ;;  %v387_v34 = vpop.f32.mrb[1].mxu1 }
  0xf9   :  { %v178_v35 = vmul.f32 %v176_v31, %v176_v31 }
  0xfb   :  { %v179_v36 = vsub.f32 %v177_v33, %v178_v35 }
  0xfd   :  { %v180_v38 = vmax.f32 %v179_v36, 0.0 }
  0xff   :  { %v182_v39 = vadd.f32 %v181_v37, %v180_v38 }
 0x101   :  { %v280_v40 = vmul.f32 -1.442695, %v182_v39 }
 0x103   :  { %445 = vpow2.f32 %v280_v40 }
 0x10d   :  { %v446_v41 = vpop.eup %445 }
 0x10e   :  { %v186_v42 = vadd.f32 1.0, %v446_v41 }
 0x110   :  { %447 = vrcp.f32 %v186_v42 }
 0x11a   :  { %v448_v43 = vpop.eup %447 }
 0x11b   :  { %391 = vmatmul.mubr.msk.f32.vlgmr.msra.gmra.mrb[2].mxu0 %vm190_vm1, %v448_v43 }
 0x1ee   :  { %v260_v44 = vpop.f32.mrb[2].mxu0 }
 0x1ef   :  { %v264_v45 = vmul.f32 %v260_v44, %v18_v26  ;;  %v392_v46 = vpop.f32.mrb[3].mxu0 }
 0x1f1   :  { %265 = vst [vmem:[#allocation2] sm:$0x1] %v264_v45 }
 0x1f2   :  { %460 = shalt.err (!%p457_p4)
}
 0x1f3   :  { %s461_s29 = scalar_lea.hbm %s578_s4, 16 }
 0x1f4   :  { %p462_p5 = scmp.ne.s32.totalorder %s578_s4, %s461_s29  ;;  %p465_p6 = scmp.lt.u32.totalorder %s461_s29, %s578_s4 }
 0x1f6   :  { %p467_p7 = pnand %p465_p6, %p462_p5 }
 0x1f8   :  { %470 = shalt.err (!%p467_p7)
}
 0x1f9   :  { %275 = dma.vmem_to_hbm [thread:$0]  %s273_s25, 16, %s578_s4, [#allocation3]  }
 0x1fa   :  { %471 = dma.done.wait [#allocation3], 16  }
 0x1fb   :  { %472 = vsyncadd [#allocation3], 4294967280 }
 0x1fc   :  { %279 = vsyncpa [#allocation3], 1 }

</bundles_post_ra>
